<compile_context>
chip_gen: v7x
topology: tpu7x:2x2x1
jax: 0.10.0
libtpu: 0.0.40
codegen_flags: <defaults>
</compile_context>

<pallas_src>
import functools

import jax
import jax.numpy as jnp
from jax import lax
from jax.experimental import pallas as pl
from jax.experimental.pallas import tpu as pltpu


def _round_up(x, m):
    return (x + m - 1) // m * m


def _cdiv(a, b):
    return (a + b - 1) // b


def _conv3x3_bn_relu_kernel(x_ref, w_ref, b_ref, o_ref, lhs_ref, *, W, TM, WIN, C_in):
    # x_ref:   [1, HWp, C_in]        bf16  (flattened NHWC image, resident per batch)
    # w_ref:   [K9_pad, C_out_pad]   bf16  (BN-folded, tap-major packed weights)
    # b_ref:   [1, C_out_pad]        f32   (folded BN bias)
    # o_ref:   [1, TM, C_out_pad]    bf16  (full-width output rows for this block)
    # lhs_ref: [TM, K9_pad]          bf16  (VMEM scratch: packed im2col LHS for this block)
    t = pl.program_id(1)
    base = pl.multiple_of(t * TM, 16)                 # TM is a multiple of 16 by construction
    win = x_ref[0, pl.ds(base, WIN), :]               # [WIN, C_in] single aligned dynamic load

    K9 = 9 * C_in
    K9_pad = lhs_ref.shape[1]
    if K9_pad > K9:                                   # zero the K padding lanes (contraction pad)
        lhs_ref[:, K9:] = jnp.zeros((TM, K9_pad - K9), lhs_ref.dtype)

    # Pack the 9 taps along the contraction axis via static slices of the window.
    for kh in range(3):
        for kw in range(3):
            j = kh * 3 + kw
            s = kh * W + kw
            lhs_ref[:, j * C_in:(j + 1) * C_in] = win[s:s + TM, :]

    acc = jnp.dot(lhs_ref[...], w_ref[...], preferred_element_type=jnp.float32)
    o_ref[0, :, :] = jnp.maximum(acc + b_ref[...], 0.0).astype(o_ref.dtype)


def fold_conv_bn_params(weight, gamma, beta, running_mean, running_var, eps=1e-5):
    """Fold eval-mode BN into the conv weights and pack for the kernel.

    Precompute once at model load (hoisted off the per-call hot path).
    Returns:
      w_packed: [round_up(9*C_in, 128), round_up(C_out, 128)] bf16
      bias_p:   [1, round_up(C_out, 128)] f32
    """
    C_out, C_in, KH, KW = weight.shape
    assert (KH, KW) == (3, 3)
    scale = gamma / jnp.sqrt(running_var + eps)                        # [C_out]
    bias = (beta - running_mean * scale).astype(jnp.float32)           # [C_out]
    w = weight * scale[:, None, None, None]                            # [C_out, C_in, 3, 3]
    # [C_out, C_in, kh, kw] -> [kh, kw, C_in, C_out] -> [9*C_in, C_out]  (tap-major rows)
    w9 = jnp.transpose(w, (2, 3, 1, 0)).reshape(KH * KW * C_in, C_out)
    K9 = KH * KW * C_in
    K9_pad = _round_up(K9, 128)
    C_out_pad = _round_up(C_out, 128)
    w_packed = jnp.pad(w9, ((0, K9_pad - K9), (0, C_out_pad - C_out))).astype(jnp.bfloat16)
    bias_p = jnp.pad(bias, (0, C_out_pad - C_out)).reshape(1, C_out_pad).astype(jnp.float32)
    return w_packed, bias_p


@functools.partial(jax.jit, static_argnames=("c_out", "block_rows"))
def hrnet_conv3x3(x_nchw, w_packed, bias_p, *, c_out, block_rows=256):
    """Conv2d(3x3, stride=1, padding=0, bias=False) + BatchNorm2d(eval) + ReLU.

    x_nchw: [N, C_in, H, W] f32; (w_packed, bias_p) from fold_conv_bn_params.
    returns: [N, c_out, H-2, W-2] f32
    """
    N, C_in, H, W = x_nchw.shape
    K9_pad, C_out_pad = w_packed.shape
    K9 = 9 * C_in
    assert K9_pad == _round_up(K9, 128)
    assert C_out_pad == _round_up(c_out, 128)
    Ho, Wo = H - 2, W - 2
    M = Ho * W                                      # full-width output rows (flat pixels)

    # ---- output-pixel tiling: >=2 blocks (v7x 2-TC), TM a multiple of 16 ----
    T = max(2, _cdiv(M, block_rows))
    TM = _round_up(_cdiv(M, T), 16)
    T = _cdiv(M, TM)
    WIN = _round_up(TM + 2 * W + 2, 16)             # rows each block reads (incl. 3x3 halo)
    HWp = _round_up(max(H * W, (T - 1) * TM + WIN), 16)

    # ---- single XLA layout pass: NCHW -> NHWC flat -> zero row pad -> bf16 ----
    x2d = jnp.transpose(x_nchw, (0, 2, 3, 1)).reshape(N, H * W, C_in)
    x2d = jnp.pad(x2d, ((0, 0), (0, HWp - H * W), (0, 0))).astype(jnp.bfloat16)

    kernel = functools.partial(_conv3x3_bn_relu_kernel, W=W, TM=TM, WIN=WIN, C_in=C_in)

    flops = 2 * N * T * TM * K9_pad * C_out_pad
    bytes_accessed = (N * HWp * C_in * 2 + K9_pad * C_out_pad * 2
                      + C_out_pad * 4 + N * T * TM * C_out_pad * 2)

    out_p = pl.pallas_call(
        kernel,
        out_shape=jax.ShapeDtypeStruct((N, T * TM, C_out_pad), jnp.bfloat16),
        grid_spec=pltpu.PrefetchScalarGridSpec(
            num_scalar_prefetch=0,
            grid=(N, T),
            in_specs=[
                # whole image resident per n (index map constant in t -> fetched once per n)
                pl.BlockSpec((1, HWp, C_in), lambda n, t: (n, 0, 0)),
                pl.BlockSpec((K9_pad, C_out_pad), lambda n, t: (0, 0)),
                pl.BlockSpec((1, C_out_pad), lambda n, t: (0, 0)),
            ],
            out_specs=pl.BlockSpec((1, TM, C_out_pad), lambda n, t: (n, t, 0)),
            scratch_shapes=[pltpu.VMEM((TM, K9_pad), jnp.bfloat16)],
        ),
        compiler_params=pltpu.CompilerParams(
            dimension_semantics=("parallel", "parallel"),
            vmem_limit_bytes=32 * 1024 * 1024),
        cost_estimate=pl.CostEstimate(
            flops=flops, transcendentals=0, bytes_accessed=bytes_accessed),
    )(x2d, w_packed, bias_p)

    # bf16 [N, T*TM, C_out_pad] -> drop pad rows / garbage cols / pad channels -> NCHW f32
    out = out_p[:, :M, :c_out].reshape(N, Ho, W, c_out)[:, :, :Wo, :]
    return jnp.transpose(out, (0, 3, 1, 2)).astype(jnp.float32)


# ----------------------------- references (test only) -----------------------------

def _reference_f32(x, weight, gamma, beta, mean, var, eps=1e-5):
    y = lax.conv_general_dilated(x, weight, (1, 1), "VALID",
                                 dimension_numbers=("NCHW", "OIHW", "NCHW"))
    scale = gamma / jnp.sqrt(var + eps)
    return jnp.maximum(y * scale[None, :, None, None]
                       + (beta - mean * scale)[None, :, None, None], 0.0)


def _reference_bf16(x, weight, gamma, beta, mean, var, eps=1e-5):
    # Same math the kernel performs (bf16 inputs / folded weights, f32 accumulation).
    scale = gamma / jnp.sqrt(var + eps)
    bias = beta - mean * scale
    xq = x.astype(jnp.bfloat16).astype(jnp.float32)
    wq = (weight * scale[:, None, None, None]).astype(jnp.bfloat16).astype(jnp.float32)
    y = lax.conv_general_dilated(xq, wq, (1, 1), "VALID",
                                 dimension_numbers=("NCHW", "OIHW", "NCHW"),
                                 precision=lax.Precision.HIGHEST)
    return jnp.maximum(y + bias[None, :, None, None], 0.0)


if __name__ == "__main__":
    key = jax.random.PRNGKey(0)
    k_x, k_w, k_g, k_b, k_m, k_v = jax.random.split(key, 6)

    N, C_in, H, W = 2, 4, 16, 16
    C_out = 8

    x = jax.random.normal(k_x, (N, C_in, H, W), dtype=jnp.float32)
    weight = jax.random.normal(k_w, (C_out, C_in, 3, 3), dtype=jnp.float32) * 0.1
    gamma = 1.0 + 0.1 * jax.random.normal(k_g, (C_out,), dtype=jnp.float32)
    beta = 0.1 * jax.random.normal(k_b, (C_out,), dtype=jnp.float32)
    running_mean = 0.1 * jax.random.normal(k_m, (C_out,), dtype=jnp.float32)
    running_var = 1.0 + 0.1 * jax.random.uniform(k_v, (C_out,), dtype=jnp.float32)

    # BN folding / weight packing hoisted off the hot path (precompute once).
    w_packed, bias_p = fold_conv_bn_params(weight, gamma, beta, running_mean, running_var)

    out = hrnet_conv3x3(x, w_packed, bias_p, c_out=C_out)
    out = jax.block_until_ready(out)

    assert out.shape == (N, C_out, H - 2, W - 2), out.shape

    # Tight check vs a reference using the exact same bf16-quantized inputs the kernel
    # uses (tolerance also absorbs the bf16 rounding of the kernel's output store).
    ref_q = _reference_bf16(x, weight, gamma, beta, running_mean, running_var)
    assert jnp.allclose(out, ref_q, atol=1e-3, rtol=1e-2), "mismatch vs bf16-quantized reference"

    # Loose sanity check vs the full-f32 reference (bf16 quantization noise only).
    ref_f = _reference_f32(x, weight, gamma, beta, running_mean, running_var)
    assert jnp.allclose(out, ref_f, atol=6e-2, rtol=6e-2), "mismatch vs f32 reference"

    print("KERNEL_OK")
</pallas_src>

<mosaic_0001>
module attributes {stable_mosaic.version = 11 : i64} {
  func.func @_conv3x3_bn_relu_kernel(%arg0: i32, %arg1: i32, %arg2: memref<1x272x4xbf16, #tpu.memory_space<vmem>>, %arg3: memref<128x128xbf16, #tpu.memory_space<vmem>>, %arg4: memref<1x128xf32, #tpu.memory_space<vmem>>, %arg5: memref<1x112x128xbf16, #tpu.memory_space<vmem>>, %arg6: memref<112x128xbf16, #tpu.memory_space<vmem>>) attributes {dimension_semantics = [#tpu.dimension_semantics<parallel>, #tpu.dimension_semantics<parallel>], iteration_bounds = array<i64: 2, 2>, scalar_prefetch = 0 : i64, scratch_operands = 1 : i64, tpu.core_type = #tpu.core_type<tc>, window_params = [{transform_indices = @transform_0, window_bounds = array<i64: 1, 272, 4>}, {pipeline_mode = #tpu.pipeline_mode<synchronous>, transform_indices = @transform_1, window_bounds = array<i64: 128, 128>}, {pipeline_mode = #tpu.pipeline_mode<synchronous>, transform_indices = @transform_2, window_bounds = array<i64: 1, 128>}, {transform_indices = @transform_3, window_bounds = array<i64: 1, 112, 128>}]} {
    %c112_i32 = arith.constant 112 : i32
    %0 = arith.muli %arg1, %c112_i32 : i32
    %1 = tpu.assume_multiple %0, 16 : i32
    %c0 = arith.constant 0 : index
    %2 = arith.index_cast %1 : i32 to index
    %c0_0 = arith.constant 0 : index
    %3 = vector.load %arg2[%c0, %2, %c0_0] : memref<1x272x4xbf16, #tpu.memory_space<vmem>>, vector<1x160x4xbf16>
    %4 = vector.shape_cast %3 : vector<1x160x4xbf16> to vector<160x4xbf16>
    %cst = arith.constant 0.000000e+00 : bf16
    %5 = vector.broadcast %cst : bf16 to vector<112x92xbf16>
    %c0_1 = arith.constant 0 : index
    %c36 = arith.constant 36 : index
    %6 = vector.load %arg6[%c0_1, %c36] : memref<112x128xbf16, #tpu.memory_space<vmem>>, vector<112x92xbf16>
    tpu.vector_store %arg6[%c0_1, %c36], %5 {strides = array<i32>} : memref<112x128xbf16, #tpu.memory_space<vmem>>, vector<112x92xbf16>,
    %7 = vector.extract_strided_slice %4 {offsets = [0, 0], sizes = [112, 4], strides = [1, 1]} : vector<160x4xbf16> to vector<112x4xbf16>
    %c0_2 = arith.constant 0 : index
    %c0_3 = arith.constant 0 : index
    %8 = vector.load %arg6[%c0_2, %c0_3] : memref<112x128xbf16, #tpu.memory_space<vmem>>, vector<112x4xbf16>
    tpu.vector_store %arg6[%c0_2, %c0_3], %7 {strides = array<i32>} : memref<112x128xbf16, #tpu.memory_space<vmem>>, vector<112x4xbf16>,
    %9 = vector.extract_strided_slice %4 {offsets = [1, 0], sizes = [112, 4], strides = [1, 1]} : vector<160x4xbf16> to vector<112x4xbf16>
    %c0_4 = arith.constant 0 : index
    %c4 = arith.constant 4 : index
    %10 = vector.load %arg6[%c0_4, %c4] : memref<112x128xbf16, #tpu.memory_space<vmem>>, vector<112x4xbf16>
    tpu.vector_store %arg6[%c0_4, %c4], %9 {strides = array<i32>} : memref<112x128xbf16, #tpu.memory_space<vmem>>, vector<112x4xbf16>,
    %11 = vector.extract_strided_slice %4 {offsets = [2, 0], sizes = [112, 4], strides = [1, 1]} : vector<160x4xbf16> to vector<112x4xbf16>
    %c0_5 = arith.constant 0 : index
    %c8 = arith.constant 8 : index
    %12 = vector.load %arg6[%c0_5, %c8] : memref<112x128xbf16, #tpu.memory_space<vmem>>, vector<112x4xbf16>
    tpu.vector_store %arg6[%c0_5, %c8], %11 {strides = array<i32>} : memref<112x128xbf16, #tpu.memory_space<vmem>>, vector<112x4xbf16>,
    %13 = vector.extract_strided_slice %4 {offsets = [16, 0], sizes = [112, 4], strides = [1, 1]} : vector<160x4xbf16> to vector<112x4xbf16>
    %c0_6 = arith.constant 0 : index
    %c12 = arith.constant 12 : index
    %14 = vector.load %arg6[%c0_6, %c12] : memref<112x128xbf16, #tpu.memory_space<vmem>>, vector<112x4xbf16>
    tpu.vector_store %arg6[%c0_6, %c12], %13 {strides = array<i32>} : memref<112x128xbf16, #tpu.memory_space<vmem>>, vector<112x4xbf16>,
    %15 = vector.extract_strided_slice %4 {offsets = [17, 0], sizes = [112, 4], strides = [1, 1]} : vector<160x4xbf16> to vector<112x4xbf16>
    %c0_7 = arith.constant 0 : index
    %c16 = arith.constant 16 : index
    %16 = vector.load %arg6[%c0_7, %c16] : memref<112x128xbf16, #tpu.memory_space<vmem>>, vector<112x4xbf16>
    tpu.vector_store %arg6[%c0_7, %c16], %15 {strides = array<i32>} : memref<112x128xbf16, #tpu.memory_space<vmem>>, vector<112x4xbf16>,
    %17 = vector.extract_strided_slice %4 {offsets = [18, 0], sizes = [112, 4], strides = [1, 1]} : vector<160x4xbf16> to vector<112x4xbf16>
    %c0_8 = arith.constant 0 : index
    %c20 = arith.constant 20 : index
    %18 = vector.load %arg6[%c0_8, %c20] : memref<112x128xbf16, #tpu.memory_space<vmem>>, vector<112x4xbf16>
    tpu.vector_store %arg6[%c0_8, %c20], %17 {strides = array<i32>} : memref<112x128xbf16, #tpu.memory_space<vmem>>, vector<112x4xbf16>,
    %19 = vector.extract_strided_slice %4 {offsets = [32, 0], sizes = [112, 4], strides = [1, 1]} : vector<160x4xbf16> to vector<112x4xbf16>
    %c0_9 = arith.constant 0 : index
    %c24 = arith.constant 24 : index
    %20 = vector.load %arg6[%c0_9, %c24] : memref<112x128xbf16, #tpu.memory_space<vmem>>, vector<112x4xbf16>
    tpu.vector_store %arg6[%c0_9, %c24], %19 {strides = array<i32>} : memref<112x128xbf16, #tpu.memory_space<vmem>>, vector<112x4xbf16>,
    %21 = vector.extract_strided_slice %4 {offsets = [33, 0], sizes = [112, 4], strides = [1, 1]} : vector<160x4xbf16> to vector<112x4xbf16>
    %c0_10 = arith.constant 0 : index
    %c28 = arith.constant 28 : index
    %22 = vector.load %arg6[%c0_10, %c28] : memref<112x128xbf16, #tpu.memory_space<vmem>>, vector<112x4xbf16>
    tpu.vector_store %arg6[%c0_10, %c28], %21 {strides = array<i32>} : memref<112x128xbf16, #tpu.memory_space<vmem>>, vector<112x4xbf16>,
    %23 = vector.extract_strided_slice %4 {offsets = [34, 0], sizes = [112, 4], strides = [1, 1]} : vector<160x4xbf16> to vector<112x4xbf16>
    %c0_11 = arith.constant 0 : index
    %c32 = arith.constant 32 : index
    %24 = vector.load %arg6[%c0_11, %c32] : memref<112x128xbf16, #tpu.memory_space<vmem>>, vector<112x4xbf16>
    tpu.vector_store %arg6[%c0_11, %c32], %23 {strides = array<i32>} : memref<112x128xbf16, #tpu.memory_space<vmem>>, vector<112x4xbf16>,
    %c0_12 = arith.constant 0 : index
    %c0_13 = arith.constant 0 : index
    %25 = vector.load %arg6[%c0_12, %c0_13] : memref<112x128xbf16, #tpu.memory_space<vmem>>, vector<112x128xbf16>
    %c0_14 = arith.constant 0 : index
    %c0_15 = arith.constant 0 : index
    %26 = vector.load %arg3[%c0_14, %c0_15] : memref<128x128xbf16, #tpu.memory_space<vmem>>, vector<128x128xbf16>
    %cst_16 = arith.constant dense<0.000000e+00> : vector<112x128xf32>
    %27 = tpu.matmul %25, %26, %cst_16 {dimension_numbers = #tpu.dot_dimension_numbers<[1], [0], [0], [1], [0, 0, 1, 1], [], []>} : vector<112x128xbf16>, vector<128x128xbf16>, vector<112x128xf32> -> vector<112x128xf32>
    %c0_17 = arith.constant 0 : index
    %c0_18 = arith.constant 0 : index
    %28 = vector.load %arg4[%c0_17, %c0_18] : memref<1x128xf32, #tpu.memory_space<vmem>>, vector<1x128xf32>
    %29 = vector.broadcast %28 : vector<1x128xf32> to vector<112x128xf32>
    %30 = arith.addf %27, %29 : vector<112x128xf32>
    %cst_19 = arith.constant 0.000000e+00 : f32
    %31 = vector.broadcast %cst_19 : f32 to vector<112x128xf32>
    %32 = arith.maximumf %30, %31 : vector<112x128xf32>
    %33 = arith.truncf %32 : vector<112x128xf32> to vector<112x128xbf16>
    %c0_20 = arith.constant 0 : index
    %c0_21 = arith.constant 0 : index
    %c0_22 = arith.constant 0 : index
    %34 = vector.load %arg5[%c0_20, %c0_21, %c0_22] : memref<1x112x128xbf16, #tpu.memory_space<vmem>>, vector<1x112x128xbf16>
    %35 = vector.shape_cast %34 : vector<1x112x128xbf16> to vector<112x128xbf16>
    %36 = vector.shape_cast %33 : vector<112x128xbf16> to vector<1x112x128xbf16>
    tpu.vector_store %arg5[%c0_20, %c0_21, %c0_22], %36 {strides = array<i32>} : memref<1x112x128xbf16, #tpu.memory_space<vmem>>, vector<1x112x128xbf16>,
    return
  }
  func.func @transform_0(%arg0: i32, %arg1: i32) -> (i32, i32, i32) {
    %c0_i32 = arith.constant 0 : i32
    %c0_i32_0 = arith.constant 0 : i32
    %c0_i32_1 = arith.constant 0 : i32
    return %arg0, %c0_i32, %c0_i32_0 : i32, i32, i32
  }
  func.func @transform_1(%arg0: i32, %arg1: i32) -> (i32, i32) {
    %c0_i32 = arith.constant 0 : i32
    %c0_i32_0 = arith.constant 0 : i32
    %c0_i32_1 = arith.constant 0 : i32
    return %c0_i32, %c0_i32_0 : i32, i32
  }
  func.func @transform_2(%arg0: i32, %arg1: i32) -> (i32, i32) {
    %c0_i32 = arith.constant 0 : i32
    %c0_i32_0 = arith.constant 0 : i32
    %c0_i32_1 = arith.constant 0 : i32
    return %c0_i32, %c0_i32_0 : i32, i32
  }
  func.func @transform_3(%arg0: i32, %arg1: i32) -> (i32, i32, i32) {
    %c0_i32 = arith.constant 0 : i32
    %c0_i32_0 = arith.constant 0 : i32
    return %arg0, %arg1, %c0_i32 : i32, i32, i32
  }
}

</mosaic_0001>

<bundles_post_ra>
// kernel: hrnet_conv3x3.1
= control target key start
LH: loop header
LB: loop body
LE: loop exit
PB: predicated region body
PF: predicated region fallthrough
CT: control target
= control target key end

     0   :  { %s1291_s12 = smov 0   ;;  %s1293_s13 = smov 0   ;;  %s1697_s0 = inlined_call_operand.vmem [shape: bf16[2,272,4], index: 0, kind: input, shape index: {}]   ;;  %s1698_s1 = inlined_call_operand.vmem [shape: bf16[128,128], index: 1, kind: input, shape index: {}]   ;;  %s1699_s2 = inlined_call_operand.vmem [shape: f32[1,128], index: 2, kind: input, shape index: {}]   ;;  %s1700_s3 = inlined_call_operand.vmem [shape: bf16[2,224,128], index: 3, kind: output, shape index: {}]  }
   0x1   :  { %s1295_s14 = smov 0   ;;  %s1297_s15 = smov 0  }
   0x2   :  { %s1299_s16 = smov 0  }
   0x3 LB: > { %s22_s17 = sadd.s32 1, %s1250_s14  ;;  %s25_s18 = sadd.s32 1, %s1254_s15  ;;  %s1258_s16 = sphi %s1299_s16, %s13_s16   ;;  %s1254_s15 = sphi %s1297_s15, %s1704_s15   ;;  %s1250_s14 = sphi %s1295_s14, %s1703_s14   ;;  %s1246_s13 = sphi %s1293_s13, %s1702_s13   ;;  %s1242_s12 = sphi %s1291_s12, %s1701_s12  }
   0x4   : > { %p23_p0 = scmp.ge.s32.totalorder %s22_s17, 2  ;;  %p976_p1 = scmp.ge.s32.totalorder %s1258_s16, 1 }
   0x5   : > { %p151_p2 = scmp.lt.s32.totalorder %s1258_s16, 5 }
   0x6   : > { %s1706_s17 = smov (%p23_p0, %s22_s17), 0  ;;  %s1708_s18 = smov (!%p23_p0, %s25_s18), %s1254_s15 }
   0x7   : > { %p152_p3 = pnand %p976_p1, %p151_p2  ;;  %p27_p4 = scmp.ge.s32.totalorder %s1708_s18, 2 }
   0x8   : > { %p179_p5 = scmp.lt.s32.totalorder (!%p152_p3), %s1246_s13, 1  ;;  %s195_s19 = smul.u32 (!%p152_p3), 112, %s1242_s12  ;;  %v1260_v0 = vmov (!%p152_p3), 0.0   ;;  %v1212_v1 = vld [vmem:[%s1698_s1] sm:$0xff] (!%p152_p3)   ;;  %v1213_v2 = vld [vmem:[%s1698_s1 + $0x8] sm:$0xff] (!%p152_p3)   ;;  %vm219_vm0 = vcmask (!%p152_p3), 1047840  }
   0x9   : > { %s1710_s18 = smov (%p27_p4, %s1708_s18), 0  ;;  %155 = sbr.rel (%p152_p3) target bundleno = 477 (0x1dd), region = 32 }
   0xa   : > { %1087 = vmatprep.subr.bf16.mxu0 (!%p152_p3), %v1260_v0  ;;  %1131 = vmatprep.subr.bf16.mxu1 (!%p152_p3), %v1260_v0  ;;  %s196_s22 = sshra.s32 (!%p152_p3), %s195_s19, 3  ;;  %vm370_vm1 = vcmask (!%p152_p3), 1046528   ;;  %v1214_v3 = vld [vmem:[%s1698_s1 + $0x10] sm:$0xff] (!%p152_p3)   ;;  %v1261_v4 = vmov (!%p152_p3), 0   ;;  %vm280_vm2 = vsmask.f32 (!%p152_p3), 7424 }
   0xb   : > { %s979_s26 = sshll.u32 (!%p152_p3), %s196_s22, 2  ;;  %1088 = vmatpush3.bf16.msra.mxu0 (!%p152_p3), %v1212_v1  ;;  %1139 = vmatpush3.bf16.msra.mxu1 (!%p152_p3), %v1212_v1  ;;  %220 = vst.msk [vmem:[#allocation2] sm:$0xff] (!%p152_p3), %vm219_vm0, %v1261_v4  ;;  %221 = vst.msk [vmem:[#allocation2 + $0x8] sm:$0xff] (!%p152_p3), %vm219_vm0, %v1261_v4  ;;  %vm269_vm3 = vcmask (!%p152_p3), 31744   ;;  %s1262_s6 = smov (!%p152_p3), 12   ;;  %v1215_v9 = vld [vmem:[%s1698_s1 + $0x18] sm:$0xff] (!%p152_p3)  }
   0xc   : > { %1089 = vmatprep.subr.bf16.mxu0 (!%p152_p3), %v1260_v0  ;;  %1132 = vmatprep.subr.bf16.mxu1 (!%p152_p3), %v1260_v0  ;;  %222 = vst.msk [vmem:[#allocation2 + $0x10] sm:$0xff] (!%p152_p3), %vm219_vm0, %v1261_v4  ;;  %223 = vst.msk [vmem:[#allocation2 + $0x18] sm:$0xff] (!%p152_p3), %vm219_vm0, %v1261_v4  ;;  %s1263_s9 = smov (!%p152_p3), 8   ;;  %s1264_s10 = smov (!%p152_p3), 24   ;;  %v1216_v26 = vld [vmem:[%s1698_s1 + $0x20] sm:$0xff] (!%p152_p3)   ;;  %v1217_v45 = vld [vmem:[%s1698_s1 + $0x28] sm:$0xff] (!%p152_p3)  }
   0xd   : > { %224 = vst.msk [vmem:[#allocation2 + $0x20] sm:$0xff] (!%p152_p3), %vm219_vm0, %v1261_v4  ;;  %225 = vst.msk [vmem:[#allocation2 + $0x28] sm:$0xff] (!%p152_p3), %vm219_vm0, %v1261_v4  ;;  %s1265_s20 = smov (!%p152_p3), 20   ;;  %s1266_s21 = smov (!%p152_p3), 32   ;;  %v1218_v57 = vld [vmem:[%s1698_s1 + $0x30] sm:$0xff] (!%p152_p3)   ;;  %vm1270_vm4 = vmmov (!%p152_p3), 0  }
   0xe   : > { %226 = vst.msk [vmem:[#allocation2 + $0x30] sm:$0xff] (!%p152_p3), %vm219_vm0, %v1261_v4  ;;  %s1267_s24 = smov (!%p152_p3), 4   ;;  %s1269_s28 = smov (!%p152_p3), 28   ;;  %1103 = vmatprep.mubr.msk.bf16.mxu0 (!%p152_p3), %vm1270_vm4, %v1260_v0  ;;  %1119 = vmatprep.mubr.msk.bf16.mxu1 (!%p152_p3), %vm1270_vm4, %v1260_v0  ;;  %vm362_vm5 = vcmask (!%p152_p3), 64544   ;;  %vm407_vm6 = vcmask (!%p152_p3), 97344   ;;  %vm439_vm7 = vcmask (!%p152_p3), 130144  }
   0xf   : > { %1090 = vmatpush3.bf16.msra.mxu0 (!%p152_p3), %v1213_v2  ;;  %1140 = vmatpush3.bf16.msra.mxu1 (!%p152_p3), %v1213_v2  ;;  %vm484_vm8 = vcmask (!%p152_p3), 162944   ;;  %vm517_vm9 = vcmask (!%p152_p3), 195744   ;;  %vm549_vm10 = vcmask (!%p152_p3), 228544   ;;  %vm594_vm11 = vcmask (!%p152_p3), 261344   ;;  %s184_s4 = smul.u32 (!%p152_p3), 14, %s1242_s12 }
  0x10   : > { %s1712_s13 = smov (!%p179_p5, %s1246_s13), 1  ;;  %1091 = vmatprep.subr.bf16.mxu0 %v1260_v0  ;;  %1133 = vmatprep.subr.bf16.mxu1 %v1260_v0  ;;  %vm627_vm12 = vcmask 294144  }
  0x11   : > { %s1147_s25 = smul.u32 136, %s1712_s13  ;;  %p187_p6 = scmp.lt.s32.totalorder %s184_s4, 27 }
  0x12   : > { %s1148_s5 = smul.u32 28, %s1712_s13 }
  0x13   : > { %s183_s29 = scalar_lea.vmem %s1697_s0, %s1147_s25  ;;  %1092 = vmatpush3.bf16.msra.mxu0 %v1214_v3  ;;  %1141 = vmatpush3.bf16.msra.mxu1 %v1214_v3  ;;  %s1268_s25 = smov 16  }
  0x14   : > { %s1340_s30 = scalar_lea.vmem %s183_s29, %s979_s26  ;;  %1093 = vmatprep.subr.bf16.mxu0 %v1260_v0  ;;  %1134 = vmatprep.subr.bf16.mxu1 %v1260_v0  ;;  %s1714_s4 = smov (!%p187_p6, %s184_s4), 27 }
  0x15   : > { %v1200_v5 = vld [vmem:[%s1340_s30 + $0x8] sm:$0xff]   ;;  %v1201_v6 = vld [vmem:[%s1340_s30] sm:$0xff]   ;;  %v1351_v8 = vld [vmem:[%s1340_s30 + $0x10] sm:$0xff]   ;;  %s190_s8 = sadd.s32 %s1148_s5, %s1714_s4 }
  0x16   : > { %418 = vrot.lane.b32.xlu1 %v1200_v5, %s1262_s6  ;;  %v372_v7 = vrot.slane %v1200_v5, 1  ;;  %271 = vst.msk [vmem:[#allocation2 + $0x8] sm:$0xff] %vm269_vm3, %v1200_v5  ;;  %v371_v10 = vrot.slane %v1201_v6, 1  ;;  %v1358_v11 = vld [vmem:[%s1340_s30 + $0x18] sm:$0xff]   ;;  %270 = vst.msk [vmem:[#allocation2] sm:$0xff] %vm269_vm3, %v1201_v6  ;;  %v374_v12 = vrot.slane %v1351_v8, 1 }
  0x17   : > { %v282_v13 = vshrl.u32 %v1201_v6, 16  ;;  %v284_v14 = vshll.u32 %v1201_v6, 16  ;;  %v289_v15 = vshll.u32 %v1200_v5, 16  ;;  %272 = vst.msk [vmem:[#allocation2 + $0x10] sm:$0xff] %vm269_vm3, %v1351_v8  ;;  %v376_v17 = vrot.slane %v1358_v11, 1  ;;  %v1368_v20 = vld [vmem:[%s1340_s30 + $0x20] sm:$0xff]   ;;  %1094 = vmatpush3.bf16.msra.mxu0 %v1215_v9  ;;  %1142 = vmatpush3.bf16.msra.mxu1 %v1215_v9 }
  0x18   : > { %v373_v16 = vsel %vm370_vm1, %v371_v10, %v372_v7  ;;  %v293_v18 = vshrl.u32 %v1200_v5, 16  ;;  %v297_v19 = vshll.u32 %v1351_v8, 16  ;;  %273 = vst.msk [vmem:[#allocation2 + $0x18] sm:$0xff] %vm269_vm3, %v1358_v11  ;;  %v1378_v21 = vsel %vm370_vm1, %v372_v7, %v374_v12  ;;  %v1382_v25 = vld [vmem:[%s1340_s30 + $0x28] sm:$0xff]   ;;  %v1395_v31 = vld [vmem:[%s1340_s30 + $0x30] sm:$0xff]   ;;  %274 = vst.msk [vmem:[#allocation2 + $0x20] sm:$0xff] %vm269_vm3, %v1368_v20  ;;  %1095 = vmatprep.subr.bf16.mxu0 %v1260_v0 }
  0x19   : > { %386 = vrot.lane.b32.xlu0 %v373_v16, %s1263_s9  ;;  %v286_v22 = vrot.slane %v284_v14, 1  ;;  %v291_v23 = vrot.slane %v289_v15, 1  ;;  %v301_v24 = vshrl.u32 %v1351_v8, 16  ;;  %v1390_v27 = vsel %vm370_vm1, %v374_v12, %v376_v17  ;;  %275 = vst.msk [vmem:[#allocation2 + $0x28] sm:$0xff] %vm269_vm3, %v1382_v25  ;;  %v1406_v37 = vld [vmem:[%s1340_s30 + $0x38] sm:$0xf]  ;;  %1135 = vmatprep.subr.bf16.mxu1 %v1260_v0 }
  0x1a   : > { %528 = vrot.lane.b32.xlu1 %v1351_v8, %s1264_s10  ;;  %v299_v28 = vrot.slane %v297_v19, 1  ;;  %v305_v29 = vshll.u32 %v1358_v11, 16  ;;  %v313_v30 = vshll.u32 %v1368_v20, 16  ;;  %v317_v34 = vshrl.u32 %v1368_v20, 16  ;;  %276 = vst.msk [vmem:[#allocation2 + $0x30] sm:$0xff] %vm269_vm3, %v1395_v31 }
  0x1b   : > { %v287_v32 = vor.u32 %v286_v22, %v282_v13  ;;  %v295_v33 = vor.u32 %v293_v18, %v291_v23  ;;  %v321_v35 = vshll.u32 %v1382_v25, 16  ;;  %v215_v40 = vld [vmem:[%s1340_s30 + $0x3c] sm:$0xf]  ;;  %v216_v47 = vld [vmem:[%s1340_s30 + $0x40] sm:$0xf]  ;;  %1096 = vmatpush3.bf16.msra.mxu0 %v1216_v26  ;;  %1143 = vmatpush3.bf16.msra.mxu1 %v1216_v26  ;;  %v378_v50 = vrot.slane %v1368_v20, 1 }
  0x1c   : > { %v1403_v36 = vrot.slane %v313_v30, 1  ;;  %v303_v38 = vor.u32 %v301_v24, %v299_v28  ;;  %v1416_v39 = vrot.slane %v305_v29, 1  ;;  %v1426_v46 = vcombine.low %v1406_v37, %v215_v40  ;;  %v217_v48 = vld [vmem:[%s1340_s30 + $0x44] sm:$0xf]  ;;  %v1211_v49 = vld [vmem:[%s1340_s30 + $0x48] ss:$0 sps:$4 sm:$0xff]   ;;  %1097 = vmatprep.subr.bf16.mxu0 %v1260_v0  ;;  %1136 = vmatprep.subr.bf16.mxu1 %v1260_v0 }
  0x1d   : > { %496 = vrot.lane.b32.xlu0 %v1378_v21, %s1265_s20  ;;  %v292_v41 = vsel %vm280_vm2, %v287_v32, %v291_v23  ;;  %v300_v42 = vsel %vm280_vm2, %v295_v33, %v299_v28  ;;  %v323_v44 = vrot.slane %v321_v35, 1  ;;  %v380_v53 = vrot.slane %v1382_v25, 1  ;;  %v1219_v13 = vld [vmem:[%s1698_s1 + $0x38] sm:$0xff]  }
  0x1e   : > { %606 = vrot.lane.b32.xlu1 %v1390_v27, %s1266_s21  ;;  %v319_v43 = vor.u32 %v317_v34, %v1403_v36  ;;  %v1438_v51 = vsel %vm280_vm2, %v303_v38, %v1416_v39  ;;  %v451_v54 = vshll.u32 %v1426_v46, 16  ;;  %v325_v55 = vshrl.u32 %v1382_v25, 16 }
  0x1f   : > { %v1446_v56 = vcombine.low %v216_v47, %v217_v48  ;;  %1098 = vmatpush3.bf16.msra.mxu0 %v1217_v45  ;;  %1144 = vmatpush3.bf16.msra.mxu1 %v1217_v45  ;;  %v329_v58 = vshll.u32 %v1395_v31, 16  ;;  %v455_v59 = vshrl.u32 %v1426_v46, 16  ;;  %v989_v60 = vcombine.low %v216_v47, %v216_v47 }
  0x20   : > { %v1441_v52 = vsel %vm280_vm2, %v319_v43, %v323_v44  ;;  %v569_v61 = vshll.u32 %v1211_v49, 16  ;;  %1099 = vmatprep.subr.bf16.mxu0 %v1260_v0  ;;  %1137 = vmatprep.subr.bf16.mxu1 %v1260_v0  ;;  %v492_v62 = vrot.slane %v1426_v46, 1  ;;  %v604_v2 = vrot.slane %v1211_v49, 1 }
  0x21   : > { %341 = vrot.lane.b32.xlu0 %v292_v41, %s1267_s24  ;;  %v561_v63 = vshll.u32 %v1446_v56, 16  ;;  %v602_v1 = vrot.slane %v1446_v56, 1  ;;  %v1465_v3 = vsel %vm370_vm1, %v378_v50, %v380_v53  ;;  %v453_v4 = vrot.slane %v451_v54, 1 }
  0x22   : > { %463 = vrot.lane.b32.xlu1 %v300_v42, %s1268_s25  ;;  %v459_v5 = vshll.u32 %v989_v60, 16  ;;  %v494_v6 = vrot.slane %v989_v60, 1  ;;  %v565_v10 = vshrl.u32 %v1446_v56, 16  ;;  %v571_v12 = vrot.slane %v569_v61, 1 }
  0x23   : > { %v563_v7 = vrot.slane %v561_v63, 1  ;;  %v1468_v9 = vsel %vm370_vm1, %v492_v62, %v602_v1  ;;  %1100 = vmatpush3.bf16.msra.mxu0 %v1218_v57  ;;  %1145 = vmatpush3.bf16.msra.mxu1 %v1218_v57  ;;  %v457_v14 = vor.u32 %v455_v59, %v453_v4  ;;  %v1483_v19 = vsel %vm370_vm1, %v602_v1, %v604_v2 }
  0x24   : > { %v461_v15 = vrot.slane %v459_v5, 1  ;;  %v1475_v16 = vsel %vm370_vm1, %v492_v62, %v494_v6  ;;  %1101 = vmatprep.subr.bf16.mxu0 %v1260_v0  ;;  %1138 = vmatprep.subr.bf16.mxu1 %v1260_v0  ;;  %v327_v22 = vor.u32 %v325_v55, %v323_v44  ;;  %v331_v23 = vrot.slane %v329_v58, 1 }
  0x25   : > { %573 = vrot.lane.b32.xlu0 %v1438_v51, %s1269_s28  ;;  %v567_v18 = vor.u32 %v565_v10, %v563_v7  ;;  %v382_v29 = vrot.slane %v1395_v31, 1  ;;  %v333_v30 = vshrl.u32 %v1395_v31, 16  ;;  %v309_v33 = vshrl.u32 %v1358_v11, 16 }
  0x26   : > { %349 = vrot.lane.b32.xlu1 %v1441_v52, %s1267_s24  ;;  %v462_v24 = vsel %vm280_vm2, %v457_v14, %v461_v15  ;;  %v332_v28 = vsel %vm280_vm2, %v327_v22, %v331_v23 }
  0x27   : > { %v1487_v26 = vsel %vm280_vm2, %v567_v18, %v571_v12  ;;  %1102 = vmatpush3.bf16.msra.mxu0 %v1219_v13  ;;  %1146 = vmatpush3.bf16.msra.mxu1 %v1219_v13  ;;  %v335_v32 = vor.u32 %v333_v30, %v331_v23  ;;  %v311_v34 = vor.u32 %v309_v33, %v1416_v39 }
  0x28   : > { %v493_v38 = vsel %vm370_vm1, %v382_v29, %v492_v62  ;;  %v379_v39 = vsel %vm370_vm1, %v376_v17, %v378_v50  ;;  %v987_v17 = vcombine.low %v1406_v37, %v1406_v37 }
  0x29   : > { %343 = vrot.lane.b32.xlu0 %v300_v42, %s1267_s24  ;;  %v316_v35 = vsel %vm280_vm2, %v311_v34, %v1403_v36 }
  0x2a   : > { %394 = vrot.lane.b32.xlu1 %v1465_v3, %s1263_s9  ;;  %v384_v37 = vrot.slane %v987_v17, 1 }
  0x2c   : > { %v385_v40 = vsel %vm370_vm1, %v382_v29, %v384_v37 }
  0x2d   : > { %388 = vrot.lane.b32.xlu0 %v1378_v21, %s1263_s9  ;;  %v383_v21 = vsel %vm370_vm1, %v380_v53, %v382_v29 }
  0x2e   : > { %426 = vrot.lane.b32.xlu1 %v1382_v25, %s1262_s6 }
  0x31   : > { %420 = vrot.lane.b32.xlu0 %v1351_v8, %s1262_s6  ;;  %v454_v8 = vsel %vm280_vm2, %v335_v32, %v453_v4 }
  0x32   : > { %471 = vrot.lane.b32.xlu1 %v332_v28, %s1268_s25 }
  0x35   : > { %465 = vrot.lane.b32.xlu0 %v1438_v51, %s1268_s25 }
  0x36   : > { %504 = vrot.lane.b32.xlu1 %v383_v21, %s1265_s20 }
  0x39   : > { %498 = vrot.lane.b32.xlu0 %v1390_v27, %s1265_s20 }
  0x3a   : > { %536 = vrot.lane.b32.xlu1 %v1395_v31, %s1264_s10 }
  0x3d   : > { %530 = vrot.lane.b32.xlu0 %v1358_v11, %s1264_s10 }
  0x3e   : > { %581 = vrot.lane.b32.xlu1 %v454_v8, %s1269_s28 }
  0x41   : > { %575 = vrot.lane.b32.xlu0 %v316_v35, %s1269_s28 }
  0x42   : > { %614 = vrot.lane.b32.xlu1 %v493_v38, %s1266_s21 }
  0x45   : > { %608 = vrot.lane.b32.xlu0 %v379_v39, %s1266_s21 }
  0x46   : > { %351 = vrot.lane.b32.xlu1 %v332_v28, %s1267_s24 }
  0x49   : > { %345 = vrot.lane.b32.xlu0 %v1438_v51, %s1267_s24 }
  0x4a   : > { %396 = vrot.lane.b32.xlu1 %v383_v21, %s1263_s9 }
  0x4d   : > { %390 = vrot.lane.b32.xlu0 %v1390_v27, %s1263_s9  ;;  %v564_v27 = vsel %vm280_vm2, %v457_v14, %v563_v7 }
  0x4e   : > { %428 = vrot.lane.b32.xlu1 %v1395_v31, %s1262_s6  ;;  %v337_v31 = vshll.u32 %v987_v17, 16 }
  0x51   : > { %422 = vrot.lane.b32.xlu0 %v1358_v11, %s1262_s6  ;;  %v339_v11 = vrot.slane %v337_v31, 1 }
  0x52   : > { %473 = vrot.lane.b32.xlu1 %v454_v8, %s1268_s25 }
  0x53   : > { %v340_v36 = vsel %vm280_vm2, %v335_v32, %v339_v11 }
  0x55   : > { %467 = vrot.lane.b32.xlu0 %v316_v35, %s1268_s25 }
  0x56   : > { %506 = vrot.lane.b32.xlu1 %v493_v38, %s1265_s20 }
  0x59   : > { %500 = vrot.lane.b32.xlu0 %v379_v39, %s1265_s20 }
  0x5a   : > { %538 = vrot.lane.b32.xlu1 %v1426_v46, %s1264_s10 }
  0x5d   : > { %532 = vrot.lane.b32.xlu0 %v1368_v20, %s1264_s10 }
  0x5e   : > { %583 = vrot.lane.b32.xlu1 %v564_v27, %s1269_s28 }
  0x61   : > { %577 = vrot.lane.b32.xlu0 %v1441_v52, %s1269_s28 }
  0x62   : > { %616 = vrot.lane.b32.xlu1 %v1468_v9, %s1266_s21 }
  0x65   : > { %610 = vrot.lane.b32.xlu0 %v1465_v3, %s1266_s21 }
  0x66   : > { %353 = vrot.lane.b32.xlu1 %v340_v36, %s1267_s24 }
  0x69   : > { %347 = vrot.lane.b32.xlu0 %v316_v35, %s1267_s24 }
  0x6a   : > { %398 = vrot.lane.b32.xlu1 %v385_v40, %s1263_s9  ;;  %v1654_v40 = vld [vmem:[%s1699_s2] ss:$0 sm:$0xff] }
  0x6d   : > { %392 = vrot.lane.b32.xlu0 %v379_v39, %s1263_s9  ;;  %s978_s9 = sshll.u32 %s190_s8, 2 }
  0x6e   : > { %430 = vrot.lane.b32.xlu1 %v1426_v46, %s1262_s6 }
  0x71   : > { %424 = vrot.lane.b32.xlu0 %v1368_v20, %s1262_s6 }
  0x72   : > { %475 = vrot.lane.b32.xlu1 %v462_v24, %s1268_s25 }
  0x75   : > { %469 = vrot.lane.b32.xlu0 %v1441_v52, %s1268_s25 }
  0x76   : > { %508 = vrot.lane.b32.xlu1 %v1475_v16, %s1265_s20 }
  0x79   : > { %502 = vrot.lane.b32.xlu0 %v1465_v3, %s1265_s20 }
  0x7a   : > { %540 = vrot.lane.b32.xlu1 %v1446_v56, %s1264_s10 }
  0x7d   : > { %534 = vrot.lane.b32.xlu0 %v1382_v25, %s1264_s10  ;;  %s1661_s10 = scalar_lea.vmem %s1700_s3, %s978_s9 }
  0x7e   : > { %585 = vrot.lane.b32.xlu1 %v1487_v26, %s1269_s28 }
  0x81   : > { %579 = vrot.lane.b32.xlu0 %v332_v28, %s1269_s28 }
  0x82   : > { %618 = vrot.lane.b32.xlu1 %v1483_v19, %s1266_s21 }
  0x85   : > { %612 = vrot.lane.b32.xlu0 %v383_v21, %s1266_s21 }
  0x88   : > { %v419_v20 = vpop.permute.xlu1 %418 }
  0x8b   : > { %v387_v41 = vpop.permute.xlu0 %386 }
  0x8c   : > { %v529_v42 = vpop.permute.xlu1 %528 }
  0x8f   : > { %v497_v43 = vpop.permute.xlu0 %496 }
  0x90   : > { %v607_v44 = vpop.permute.xlu1 %606 }
  0x93   : > { %v342_v45 = vpop.permute.xlu0 %341 }
  0x94   : > { %v464_v25 = vpop.permute.xlu1 %463  ;;  %363 = vst.msk [vmem:[#allocation2] sm:$0xff] %vm362_vm5, %v342_v45 }
  0x95   : > { %408 = vst.msk [vmem:[#allocation2] sm:$0xff] %vm407_vm6, %v387_v41 }
  0x96   : > { %440 = vst.msk [vmem:[#allocation2] sm:$0xff] %vm439_vm7, %v419_v20 }
  0x97   : > { %485 = vst.msk [vmem:[#allocation2] sm:$0xff] %vm484_vm8, %v464_v25  ;;  %v574_v46 = vpop.permute.xlu0 %573 }
  0x98   : > { %v350_v47 = vpop.permute.xlu1 %349  ;;  %518 = vst.msk [vmem:[#allocation2] sm:$0xff] %vm517_vm9, %v497_v43 }
  0x99   : > { %367 = vst.msk [vmem:[#allocation2 + $0x20] sm:$0xff] %vm362_vm5, %v350_v47 }
  0x9a   : > { %550 = vst.msk [vmem:[#allocation2] sm:$0xff] %vm549_vm10, %v529_v42 }
  0x9b   : > { %595 = vst.msk [vmem:[#allocation2] sm:$0xff] %vm594_vm11, %v574_v46  ;;  %v344_v48 = vpop.permute.xlu0 %343 }
  0x9c   : > { %628 = vst.msk [vmem:[#allocation2] sm:$0xff] %vm627_vm12, %v607_v44  ;;  %v395_v49 = vpop.permute.xlu1 %394 }
  0x9d   : > { %364 = vst.msk [vmem:[#allocation2 + $0x8] sm:$0xff] %vm362_vm5, %v344_v48 }
  0x9e   : > { %412 = vst.msk [vmem:[#allocation2 + $0x20] sm:$0xff] %vm407_vm6, %v395_v49 }
  0x9f   : > { %v389_v50 = vpop.permute.xlu0 %388 }
  0xa0   : > { %v427_v51 = vpop.permute.xlu1 %426  ;;  %409 = vst.msk [vmem:[#allocation2 + $0x8] sm:$0xff] %vm407_vm6, %v389_v50 }
  0xa1   : > { %444 = vst.msk [vmem:[#allocation2 + $0x20] sm:$0xff] %vm439_vm7, %v427_v51 }
  0xa3   : > { %v635_v52 = vld [vmem:[#allocation2] sm:$0xff]  ;;  %v421_v53 = vpop.permute.xlu0 %420 }
  0xa4   : > { %1104 = vmatmul.mubr.bf16.vlgmr.msra.gmra.mrb[0].mxu0 %v635_v52  ;;  %v472_v54 = vpop.permute.xlu1 %471  ;;  %441 = vst.msk [vmem:[#allocation2 + $0x8] sm:$0xff] %vm439_vm7, %v421_v53 }
  0xa5   : > { %489 = vst.msk [vmem:[#allocation2 + $0x20] sm:$0xff] %vm484_vm8, %v472_v54  ;;  %1107 = vmatprep.mubr.msk.bf16.mxu0 %vm1270_vm4, %v1260_v0 }
  0xa7   : > { %v466_v55 = vpop.permute.xlu0 %465 }
  0xa8   : > { %v505_v56 = vpop.permute.xlu1 %504  ;;  %486 = vst.msk [vmem:[#allocation2 + $0x8] sm:$0xff] %vm484_vm8, %v466_v55 }
  0xa9   : > { %522 = vst.msk [vmem:[#allocation2 + $0x20] sm:$0xff] %vm517_vm9, %v505_v56 }
  0xab   : > { %v499_v57 = vpop.permute.xlu0 %498 }
  0xac   : > { %v537_v58 = vpop.permute.xlu1 %536  ;;  %519 = vst.msk [vmem:[#allocation2 + $0x8] sm:$0xff] %vm517_vm9, %v499_v57 }
  0xad   : > { %554 = vst.msk [vmem:[#allocation2 + $0x20] sm:$0xff] %vm549_vm10, %v537_v58 }
  0xaf   : > { %v531_v59 = vpop.permute.xlu0 %530 }
  0xb0   : > { %v582_v60 = vpop.permute.xlu1 %581  ;;  %551 = vst.msk [vmem:[#allocation2 + $0x8] sm:$0xff] %vm549_vm10, %v531_v59 }
  0xb1   : > { %599 = vst.msk [vmem:[#allocation2 + $0x20] sm:$0xff] %vm594_vm11, %v582_v60 }
  0xb3   : > { %v576_v61 = vpop.permute.xlu0 %575 }
  0xb4   : > { %v615_v62 = vpop.permute.xlu1 %614  ;;  %596 = vst.msk [vmem:[#allocation2 + $0x8] sm:$0xff] %vm594_vm11, %v576_v61 }
  0xb5   : > { %632 = vst.msk [vmem:[#allocation2 + $0x20] sm:$0xff] %vm627_vm12, %v615_v62 }
  0xb7   : > { %v609_v63 = vpop.permute.xlu0 %608 }
  0xb8   : > { %v352_v1 = vpop.permute.xlu1 %351  ;;  %629 = vst.msk [vmem:[#allocation2 + $0x8] sm:$0xff] %vm627_vm12, %v609_v63 }
  0xb9   : > { %368 = vst.msk [vmem:[#allocation2 + $0x28] sm:$0xff] %vm362_vm5, %v352_v1 }
  0xbb   : > { %v346_v2 = vpop.permute.xlu0 %345 }
  0xbc   : > { %v397_v3 = vpop.permute.xlu1 %396  ;;  %v639_v4 = vld [vmem:[#allocation2 + $0x20] sm:$0xff]  ;;  %365 = vst.msk [vmem:[#allocation2 + $0x10] sm:$0xff] %vm362_vm5, %v346_v2 }
  0xbd   : > { %413 = vst.msk [vmem:[#allocation2 + $0x28] sm:$0xff] %vm407_vm6, %v397_v3  ;;  %1120 = vmatmul.mubr.bf16.vlgmr.msra.gmra.mrb[0].mxu1 %v639_v4 }
  0xbe   : > { %1123 = vmatprep.mubr.msk.bf16.mxu1 %vm1270_vm4, %v1260_v0 }
  0xbf   : > { %v391_v5 = vpop.permute.xlu0 %390  ;;  %v636_v7 = vld [vmem:[#allocation2 + $0x8] sm:$0xff] }
  0xc0   : > { %v429_v6 = vpop.permute.xlu1 %428  ;;  %410 = vst.msk [vmem:[#allocation2 + $0x10] sm:$0xff] %vm407_vm6, %v391_v5  ;;  %1108 = vmatmul.mubr.bf16.gmra.mrb[4].mxu0 %v636_v7 }
  0xc1   : > { %445 = vst.msk [vmem:[#allocation2 + $0x28] sm:$0xff] %vm439_vm7, %v429_v6  ;;  %1111 = vmatprep.mubr.msk.bf16.mxu0 %vm1270_vm4, %v1260_v0 }
  0xc3   : > { %v423_v9 = vpop.permute.xlu0 %422 }
  0xc4   : > { %v474_v10 = vpop.permute.xlu1 %473  ;;  %442 = vst.msk [vmem:[#allocation2 + $0x10] sm:$0xff] %vm439_vm7, %v423_v9 }
  0xc5   : > { %490 = vst.msk [vmem:[#allocation2 + $0x28] sm:$0xff] %vm484_vm8, %v474_v10 }
  0xc7   : > { %v468_v12 = vpop.permute.xlu0 %467 }
  0xc8   : > { %v507_v13 = vpop.permute.xlu1 %506  ;;  %487 = vst.msk [vmem:[#allocation2 + $0x10] sm:$0xff] %vm484_vm8, %v468_v12 }
  0xc9   : > { %523 = vst.msk [vmem:[#allocation2 + $0x28] sm:$0xff] %vm517_vm9, %v507_v13 }
  0xcb   : > { %v501_v14 = vpop.permute.xlu0 %500 }
  0xcc   : > { %v539_v15 = vpop.permute.xlu1 %538  ;;  %520 = vst.msk [vmem:[#allocation2 + $0x10] sm:$0xff] %vm517_vm9, %v501_v14 }
  0xcd   : > { %555 = vst.msk [vmem:[#allocation2 + $0x28] sm:$0xff] %vm549_vm10, %v539_v15 }
  0xcf   : > { %v533_v16 = vpop.permute.xlu0 %532 }
  0xd0   : > { %v584_v18 = vpop.permute.xlu1 %583  ;;  %552 = vst.msk [vmem:[#allocation2 + $0x10] sm:$0xff] %vm549_vm10, %v533_v16 }
  0xd1   : > { %600 = vst.msk [vmem:[#allocation2 + $0x28] sm:$0xff] %vm594_vm11, %v584_v18 }
  0xd3   : > { %v578_v19 = vpop.permute.xlu0 %577 }
  0xd4   : > { %v617_v22 = vpop.permute.xlu1 %616  ;;  %597 = vst.msk [vmem:[#allocation2 + $0x10] sm:$0xff] %vm594_vm11, %v578_v19 }
  0xd5   : > { %633 = vst.msk [vmem:[#allocation2 + $0x28] sm:$0xff] %vm627_vm12, %v617_v22 }
  0xd7   : > { %v611_v23 = vpop.permute.xlu0 %610 }
  0xd8   : > { %v354_v24 = vpop.permute.xlu1 %353  ;;  %630 = vst.msk [vmem:[#allocation2 + $0x10] sm:$0xff] %vm627_vm12, %v611_v23 }
  0xd9   : > { %369 = vst.msk [vmem:[#allocation2 + $0x30] sm:$0xff] %vm362_vm5, %v354_v24 }
  0xdb   : > { %v348_v26 = vpop.permute.xlu0 %347 }
  0xdc   : > { %v399_v28 = vpop.permute.xlu1 %398  ;;  %v640_v29 = vld [vmem:[#allocation2 + $0x28] sm:$0xff]  ;;  %366 = vst.msk [vmem:[#allocation2 + $0x18] sm:$0xff] %vm362_vm5, %v348_v26 }
  0xdd   : > { %414 = vst.msk [vmem:[#allocation2 + $0x30] sm:$0xff] %vm407_vm6, %v399_v28  ;;  %1124 = vmatmul.mubr.bf16.gmra.mrb[4].mxu1 %v640_v29 }
  0xde   : > { %1127 = vmatprep.mubr.msk.bf16.mxu1 %vm1270_vm4, %v1260_v0 }
  0xdf   : > { %v393_v21 = vpop.permute.xlu0 %392  ;;  %v637_v32 = vld [vmem:[#allocation2 + $0x10] sm:$0xff] }
  0xe0   : > { %v431_v30 = vpop.permute.xlu1 %430  ;;  %411 = vst.msk [vmem:[#allocation2 + $0x18] sm:$0xff] %vm407_vm6, %v393_v21  ;;  %1112 = vmatmul.mubr.bf16.gmra.mrb[8].mxu0 %v637_v32 }
  0xe1   : > { %446 = vst.msk [vmem:[#allocation2 + $0x30] sm:$0xff] %vm439_vm7, %v431_v30  ;;  %1115 = vmatprep.mubr.msk.bf16.mxu0 %vm1270_vm4, %v1260_v0 }
  0xe3   : > { %v425_v33 = vpop.permute.xlu0 %424 }
  0xe4   : > { %v476_v8 = vpop.permute.xlu1 %475  ;;  %443 = vst.msk [vmem:[#allocation2 + $0x18] sm:$0xff] %vm439_vm7, %v425_v33 }
  0xe5   : > { %491 = vst.msk [vmem:[#allocation2 + $0x30] sm:$0xff] %vm484_vm8, %v476_v8 }
  0xe7   : > { %v470_v34 = vpop.permute.xlu0 %469 }
  0xe8   : > { %v509_v35 = vpop.permute.xlu1 %508  ;;  %488 = vst.msk [vmem:[#allocation2 + $0x18] sm:$0xff] %vm484_vm8, %v470_v34 }
  0xe9   : > { %524 = vst.msk [vmem:[#allocation2 + $0x30] sm:$0xff] %vm517_vm9, %v509_v35 }
  0xeb   : > { %v503_v38 = vpop.permute.xlu0 %502 }
  0xec   : > { %v541_v39 = vpop.permute.xlu1 %540  ;;  %521 = vst.msk [vmem:[#allocation2 + $0x18] sm:$0xff] %vm517_vm9, %v503_v38 }
  0xed   : > { %556 = vst.msk [vmem:[#allocation2 + $0x30] sm:$0xff] %vm549_vm10, %v541_v39 }
  0xef   : > { %v535_v0 = vpop.permute.xlu0 %534 }
  0xf0   : > { %v586_v17 = vpop.permute.xlu1 %585  ;;  %553 = vst.msk [vmem:[#allocation2 + $0x18] sm:$0xff] %vm549_vm10, %v535_v0 }
  0xf1   : > { %601 = vst.msk [vmem:[#allocation2 + $0x30] sm:$0xff] %vm594_vm11, %v586_v17 }
  0xf3   : > { %v580_v27 = vpop.permute.xlu0 %579 }
  0xf4   : > { %v619_v31 = vpop.permute.xlu1 %618  ;;  %598 = vst.msk [vmem:[#allocation2 + $0x18] sm:$0xff] %vm594_vm11, %v580_v27 }
  0xf5   : > { %634 = vst.msk [vmem:[#allocation2 + $0x30] sm:$0xff] %vm627_vm12, %v619_v31 }
  0xf7   : > { %v613_v11 = vpop.permute.xlu0 %612 }
  0xf8   : > { %631 = vst.msk [vmem:[#allocation2 + $0x18] sm:$0xff] %vm627_vm12, %v613_v11 }
  0xfc   : > { %v641_v36 = vld [vmem:[#allocation2 + $0x30] sm:$0xff] }
  0xfd   : > { %1128 = vmatmul.mubr.bf16.gmra.mrb[8].mxu1 %v641_v36 }
  0xff   : > { %v638_v37 = vld [vmem:[#allocation2 + $0x18] sm:$0xff] }
 0x100   : > { %1116 = vmatmul.mubr.bf16.gmra.mrb[12].mxu0 %v638_v37 }
 0x177   : > { %v747_v20 = vpop.f32.mrb[0].mxu0 }
 0x178   : > { %v748_v41 = vadd.f32 %v1654_v40, %v747_v20  ;;  %v1105_v42 = vpop.f32.mrb[1].mxu0 }
 0x179   : > { %v750_v43 = vpop.f32.mrb[2].mxu0 }
 0x17a   : > { %v751_v44 = vadd.f32 %v1654_v40, %v750_v43  ;;  %v1106_v45 = vpop.f32.mrb[3].mxu0  ;;  %v802_v25 = vmax.f32 %v748_v41, 0.0 }
 0x17c   : > { %v803_v46 = vmax.f32 %v751_v44, 0.0 }
 0x17e   : > { %v1034_v47 = vpack.c.bf16 %v803_v46, %v802_v25 }
 0x180   : > { %1035 = vst [vmem:[%s1661_s10] sm:$0xff] %v1034_v47  }
 0x190   : > { %v779_v48 = vpop.f32.mrb[0].mxu1 }
 0x191   : > { %v780_v49 = vadd.f32 %v1654_v40, %v779_v48  ;;  %v1121_v50 = vpop.f32.mrb[1].mxu1 }
 0x192   : > { %v782_v51 = vpop.f32.mrb[2].mxu1 }
 0x193   : > { %v810_v52 = vmax.f32 %v780_v49, 0.0  ;;  %v783_v53 = vadd.f32 %v1654_v40, %v782_v51  ;;  %v1122_v54 = vpop.f32.mrb[3].mxu1  ;;  %v755_v55 = vpop.f32.mrb[4].mxu0 }
 0x194   : > { %v756_v57 = vadd.f32 %v1654_v40, %v755_v55  ;;  %v1109_v58 = vpop.f32.mrb[5].mxu0 }
 0x195   : > { %v811_v56 = vmax.f32 %v783_v53, 0.0  ;;  %v758_v59 = vpop.f32.mrb[6].mxu0 }
 0x196   : > { %v759_v61 = vadd.f32 %v1654_v40, %v758_v59  ;;  %v1110_v62 = vpop.f32.mrb[7].mxu0  ;;  %v804_v63 = vmax.f32 %v756_v57, 0.0 }
 0x197   : > { %v1054_v60 = vpack.c.bf16 %v811_v56, %v810_v52 }
 0x198   : > { %v805_v1 = vmax.f32 %v759_v61, 0.0 }
 0x199   : > { %1069 = vst [vmem:[%s1661_s10 + $0x20] sm:$0xff] %v1054_v60  }
 0x19a   : > { %v1039_v2 = vpack.c.bf16 %v805_v1, %v804_v63 }
 0x19c   : > { %1066 = vst [vmem:[%s1661_s10 + $0x8] sm:$0xff] %v1039_v2  }
 0x1b0   : > { %v787_v3 = vpop.f32.mrb[4].mxu1 }
 0x1b1   : > { %v788_v4 = vadd.f32 %v1654_v40, %v787_v3  ;;  %v1125_v5 = vpop.f32.mrb[5].mxu1 }
 0x1b2   : > { %v790_v6 = vpop.f32.mrb[6].mxu1 }
 0x1b3   : > { %v812_v7 = vmax.f32 %v788_v4, 0.0  ;;  %v791_v9 = vadd.f32 %v1654_v40, %v790_v6  ;;  %v1126_v10 = vpop.f32.mrb[7].mxu1  ;;  %v763_v12 = vpop.f32.mrb[8].mxu0 }
 0x1b4   : > { %v764_v14 = vadd.f32 %v1654_v40, %v763_v12  ;;  %v1113_v15 = vpop.f32.mrb[9].mxu0 }
 0x1b5   : > { %v813_v13 = vmax.f32 %v791_v9, 0.0  ;;  %v766_v16 = vpop.f32.mrb[10].mxu0 }
 0x1b6   : > { %v767_v19 = vadd.f32 %v1654_v40, %v766_v16  ;;  %v1114_v22 = vpop.f32.mrb[11].mxu0  ;;  %v806_v23 = vmax.f32 %v764_v14, 0.0 }
 0x1b7   : > { %v1059_v18 = vpack.c.bf16 %v813_v13, %v812_v7 }
 0x1b8   : > { %v807_v24 = vmax.f32 %v767_v19, 0.0 }
 0x1b9   : > { %1070 = vst [vmem:[%s1661_s10 + $0x28] sm:$0xff] %v1059_v18  }
 0x1ba   : > { %v1044_v26 = vpack.c.bf16 %v807_v24, %v806_v23 }
 0x1bc   : > { %1067 = vst [vmem:[%s1661_s10 + $0x10] sm:$0xff] %v1044_v26  }
 0x1d0   : > { %v795_v28 = vpop.f32.mrb[8].mxu1 }
 0x1d1   : > { %v796_v29 = vadd.f32 %v1654_v40, %v795_v28  ;;  %v1129_v21 = vpop.f32.mrb[9].mxu1 }
 0x1d2   : > { %v798_v30 = vpop.f32.mrb[10].mxu1 }
 0x1d3   : > { %v814_v32 = vmax.f32 %v796_v29, 0.0  ;;  %v799_v33 = vadd.f32 %v1654_v40, %v798_v30  ;;  %v1130_v8 = vpop.f32.mrb[11].mxu1  ;;  %v771_v34 = vpop.f32.mrb[12].mxu0 }
 0x1d4   : > { %v772_v38 = vadd.f32 %v1654_v40, %v771_v34  ;;  %v1117_v39 = vpop.f32.mrb[13].mxu0 }
 0x1d5   : > { %v815_v35 = vmax.f32 %v799_v33, 0.0  ;;  %v774_v0 = vpop.f32.mrb[14].mxu0 }
 0x1d6   : > { %v775_v27 = vadd.f32 %v1654_v40, %v774_v0  ;;  %v1118_v31 = vpop.f32.mrb[15].mxu0  ;;  %v808_v11 = vmax.f32 %v772_v38, 0.0 }
 0x1d7   : > { %v1064_v17 = vpack.c.bf16 %v815_v35, %v814_v32 }
 0x1d8   : > { %v809_v36 = vmax.f32 %v775_v27, 0.0 }
 0x1d9   : > { %1071 = vst [vmem:[%s1661_s10 + $0x30] sm:$0xff] %v1064_v17  }
 0x1da   : > { %v1049_v37 = vpack.c.bf16 %v809_v36, %v808_v11 }
 0x1dc   : > { %1068 = vst [vmem:[%s1661_s10 + $0x18] sm:$0xff] %v1049_v37  }
 0x1dd PF: > { %s13_s16 = sadd.s32 1, %s1258_s16   ;;  %s1701_s12 = smov %s1250_s14 }
 0x1de   : > { %p10_p7 = scmp.ge.s32.totalorder %s13_s16, 6   ;;  %s1702_s13 = smov %s1254_s15 }
 0x1df   : > { %s1703_s14 = smov %s1706_s17  ;;  %s1704_s15 = smov %s1710_s18 }
 0x1e0   :  { %12 = sbr.rel (!%p10_p7) target bundleno = 3 (0x3), region = 63 }

</bundles_post_ra>
